<compile_context>
chip_gen: v6e
topology: v6e:2x2x1
jax: 0.10.0
libtpu: 0.0.40
codegen_flags: <defaults>
</compile_context>

<pallas_src>
import math

import jax
import jax.numpy as jnp
from jax.experimental import pallas as pl
from jax.experimental.pallas import tpu as pltpu

X_DIM = 784          # fixed by x.view(-1, 784) / .view(-1, 28, 28)
H_DIM1 = 64
H_DIM2 = 32
Z_DIM = 16
LAT_PAD = 128        # fused mu|log_var head padded to a full lane-dense vreg
BATCH = 2
MAX_TILE_B = 512     # cap keeps double-buffered x+recon under v5e's 16 MiB scoped VMEM


def _round_up(v, m):
    return ((v + m - 1) // m) * m


def _choose_tile_b(b):
    """Batch-tile heuristic per perf review: sublane-pad tiny batches, >=2 tiles when
    possible (v7x megacore), cap at 512 rows (v5e scoped-VMEM default)."""
    if b <= 8:
        return 8
    if b <= 2 * MAX_TILE_B:
        return _round_up(pl.cdiv(b, 2), 8)       # two tiles -> both TCs busy on v7x
    return MAX_TILE_B


def _vae_kernel(x_ref, eps_ref,
                w1_ref, b1_ref, w2_ref, b2_ref,
                wlat_ref, blat_ref,
                wd1_ref, bd1_ref, wd2_ref, bd2_ref, wd3_ref, bd3_ref,
                recon_ref, latent_ref):
    x = x_ref[...]                                                   # (TB, 784) bf16

    # ---- encoder: Linear + ReLU, Linear + ReLU (bf16 MXU operands, f32 acc) ----
    h = jnp.dot(x, w1_ref[...], preferred_element_type=jnp.float32) + b1_ref[...]
    h = jnp.maximum(h, 0.0)
    h = jnp.dot(h.astype(jnp.bfloat16), w2_ref[...],
                preferred_element_type=jnp.float32) + b2_ref[...]
    h = jnp.maximum(h, 0.0)

    # ---- fused latent heads: one (H2, 128) matmul; lane-dense (TB, 128) store ----
    lat = jnp.dot(h.astype(jnp.bfloat16), wlat_ref[...],
                  preferred_element_type=jnp.float32) + blat_ref[...]
    latent_ref[...] = lat
    mu = lat[:, :Z_DIM]
    log_var = lat[:, Z_DIM:2 * Z_DIM]

    # ---- reparameterization (f32): z = exp(0.5*log_var)*eps + mu ----
    std = jnp.exp(0.5 * log_var)
    z = std * eps_ref[...] + mu

    # ---- decoder: Linear+ReLU, Linear+ReLU, Linear+Sigmoid ----
    d = jnp.dot(z.astype(jnp.bfloat16), wd1_ref[...],
                preferred_element_type=jnp.float32) + bd1_ref[...]
    d = jnp.maximum(d, 0.0)
    d = jnp.dot(d.astype(jnp.bfloat16), wd2_ref[...],
                preferred_element_type=jnp.float32) + bd2_ref[...]
    d = jnp.maximum(d, 0.0)
    logits = jnp.dot(d.astype(jnp.bfloat16), wd3_ref[...],
                     preferred_element_type=jnp.float32) + bd3_ref[...]

    # exact sigmoid (EUP has slack in this DMA-bound kernel); matches torch.sigmoid.
    recon_ref[...] = 1.0 / (1.0 + jnp.exp(-logits))


def vae_forward(x, eps, params, *, tile_b=None):
    """x: (B, 1, 28, 28) float32 (NCHW). eps: (B, Z_DIM) float32.
    Returns (recon (B,28,28), mu (B,Z), log_var (B,Z))."""
    b = x.shape[0]
    if tile_b is None:
        tile_b = _choose_tile_b(b)

    # Cast to bf16 in the wrapper (fold into the pad copy) -> halves the x DMA stream.
    x2d = x.reshape(b, X_DIM).astype(jnp.bfloat16)      # == torch x.view(-1, 784)
    eps_f = eps.astype(jnp.float32)

    n_tiles = pl.cdiv(b, tile_b)
    b_pad = n_tiles * tile_b
    if b_pad != b:
        x2d = jnp.pad(x2d, ((0, b_pad - b), (0, 0)))
        eps_f = jnp.pad(eps_f, ((0, b_pad - b), (0, 0)))

    flat_inputs = [x2d, eps_f] + list(params)

    # Batch-tiled inputs/outputs; weights/biases resident across all grid steps.
    def batch_map(i):
        return (i, 0)

    def resident_map(i):
        return (0, 0)

    in_specs = [
        pl.BlockSpec((tile_b, X_DIM), batch_map),       # x (bf16)
        pl.BlockSpec((tile_b, Z_DIM), batch_map),       # eps (f32)
    ] + [pl.BlockSpec(p.shape, resident_map) for p in params]

    out_specs = (
        pl.BlockSpec((tile_b, X_DIM), batch_map),       # recon (784 = full last dim)
        pl.BlockSpec((tile_b, LAT_PAD), batch_map),     # fused mu|log_var (lane-dense 128)
    )

    # Advisory cost estimate so XLA schedules the call sensibly.
    flops = 2 * b_pad * (X_DIM * H_DIM1 + H_DIM1 * H_DIM2 + H_DIM2 * LAT_PAD
                         + Z_DIM * H_DIM2 + H_DIM2 * H_DIM1 + H_DIM1 * X_DIM)
    transcendentals = b_pad * (X_DIM + Z_DIM)           # sigmoid exp, reparam exp
    bytes_accessed = (sum(int(a.size) * a.dtype.itemsize for a in flat_inputs)
                      + b_pad * X_DIM * 4 + b_pad * LAT_PAD * 4)
    cost = pl.CostEstimate(flops=int(flops), transcendentals=int(transcendentals),
                           bytes_accessed=int(bytes_accessed))

    recon_pad, latent = pl.pallas_call(
        _vae_kernel,
        out_shape=(
            jax.ShapeDtypeStruct((b_pad, X_DIM), jnp.float32),
            jax.ShapeDtypeStruct((b_pad, LAT_PAD), jnp.float32),
        ),
        grid=(n_tiles,),
        in_specs=in_specs,
        out_specs=out_specs,
        compiler_params=pltpu.CompilerParams(
            dimension_semantics=("parallel",)),
        cost_estimate=cost,
    )(*flat_inputs)

    recon = recon_pad[:b].reshape(b, 28, 28)            # == torch .view(-1, 28, 28)
    mu = latent[:b, :Z_DIM]
    log_var = latent[:b, Z_DIM:2 * Z_DIM]
    return recon, mu, log_var


def _init_linear(key, in_dim, out_dim):
    """PyTorch nn.Linear default init: U(-1/sqrt(in), 1/sqrt(in)) for W and b.
    Weight stored pre-transposed (in_dim, out_dim) so the kernel does x @ W."""
    kw, kb = jax.random.split(key)
    bound = 1.0 / math.sqrt(in_dim)
    w = jax.random.uniform(kw, (in_dim, out_dim), jnp.float32, -bound, bound)
    b = jax.random.uniform(kb, (1, out_dim), jnp.float32, -bound, bound)
    return w, b


def make_params(key):
    """Kernel-ready params: bf16 weights (MXU operands), f32 biases, fused mu|log_var
    head zero-padded to 128 lanes so the latent output store is unmasked."""
    keys = jax.random.split(key, 7)
    w1, b1 = _init_linear(keys[0], X_DIM, H_DIM1)       # encoder[0]
    w2, b2 = _init_linear(keys[1], H_DIM1, H_DIM2)      # encoder[2]
    wmu, bmu = _init_linear(keys[2], H_DIM2, Z_DIM)     # enc_mu
    wstd, bstd = _init_linear(keys[3], H_DIM2, Z_DIM)   # enc_std
    wd1, bd1 = _init_linear(keys[4], Z_DIM, H_DIM2)     # decoder[0]
    wd2, bd2 = _init_linear(keys[5], H_DIM2, H_DIM1)    # decoder[2]
    wd3, bd3 = _init_linear(keys[6], H_DIM1, X_DIM)     # decoder[4]

    # Fuse the two latent heads into one matmul and pad to 128 lane-dense output columns.
    wlat = jnp.concatenate([wmu, wstd], axis=1)                     # (H_DIM2, 2*Z)
    blat = jnp.concatenate([bmu, bstd], axis=1)                     # (1, 2*Z)
    wlat = jnp.pad(wlat, ((0, 0), (0, LAT_PAD - 2 * Z_DIM)))        # (H_DIM2, 128)
    blat = jnp.pad(blat, ((0, 0), (0, LAT_PAD - 2 * Z_DIM)))        # (1, 128)

    bf16 = jnp.bfloat16
    return (w1.astype(bf16), b1,
            w2.astype(bf16), b2,
            wlat.astype(bf16), blat,
            wd1.astype(bf16), bd1,
            wd2.astype(bf16), bd2,
            wd3.astype(bf16), bd3)


if __name__ == "__main__":
    root = jax.random.PRNGKey(0)
    k_params, k_x, k_eps = jax.random.split(root, 3)

    params = make_params(k_params)
    x = jax.random.uniform(k_x, (BATCH, 1, 28, 28), jnp.float32)   # MNIST-like NCHW input
    # torch.randn_like(std) sampled host-side (deterministic here) and fed to the kernel.
    eps = jax.random.normal(k_eps, (BATCH, Z_DIM), jnp.float32)

    recon, mu, log_var = jax.block_until_ready(vae_forward(x, eps, params))

    assert recon.shape == (BATCH, 28, 28)
    assert mu.shape == (BATCH, Z_DIM)
    assert log_var.shape == (BATCH, Z_DIM)
    assert bool(jnp.all(jnp.isfinite(recon)))
    assert bool(jnp.all(jnp.isfinite(mu)))
    assert bool(jnp.all(jnp.isfinite(log_var)))
    assert bool(jnp.all((recon >= 0.0) & (recon <= 1.0)))          # sigmoid range
    print("KERNEL_OK")
</pallas_src>

<mosaic_0001>
module attributes {stable_mosaic.version = 11 : i64} {
  func.func @_vae_kernel(%arg0: i32, %arg1: memref<8x784xbf16, #tpu.memory_space<vmem>>, %arg2: memref<8x16xf32, #tpu.memory_space<vmem>>, %arg3: memref<784x64xbf16, #tpu.memory_space<vmem>>, %arg4: memref<1x64xf32, #tpu.memory_space<vmem>>, %arg5: memref<64x32xbf16, #tpu.memory_space<vmem>>, %arg6: memref<1x32xf32, #tpu.memory_space<vmem>>, %arg7: memref<32x128xbf16, #tpu.memory_space<vmem>>, %arg8: memref<1x128xf32, #tpu.memory_space<vmem>>, %arg9: memref<16x32xbf16, #tpu.memory_space<vmem>>, %arg10: memref<1x32xf32, #tpu.memory_space<vmem>>, %arg11: memref<32x64xbf16, #tpu.memory_space<vmem>>, %arg12: memref<1x64xf32, #tpu.memory_space<vmem>>, %arg13: memref<64x784xbf16, #tpu.memory_space<vmem>>, %arg14: memref<1x784xf32, #tpu.memory_space<vmem>>, %arg15: memref<8x784xf32, #tpu.memory_space<vmem>>, %arg16: memref<8x128xf32, #tpu.memory_space<vmem>>) attributes {dimension_semantics = [#tpu.dimension_semantics<parallel>], iteration_bounds = array<i64: 1>, scalar_prefetch = 0 : i64, scratch_operands = 0 : i64, tpu.core_type = #tpu.core_type<tc>, window_params = [{transform_indices = @transform_0, window_bounds = array<i64: 8, 784>}, {transform_indices = @transform_1, window_bounds = array<i64: 8, 16>}, {pipeline_mode = #tpu.pipeline_mode<synchronous>, transform_indices = @transform_2, window_bounds = array<i64: 784, 64>}, {pipeline_mode = #tpu.pipeline_mode<synchronous>, transform_indices = @transform_3, window_bounds = array<i64: 1, 64>}, {pipeline_mode = #tpu.pipeline_mode<synchronous>, transform_indices = @transform_4, window_bounds = array<i64: 64, 32>}, {pipeline_mode = #tpu.pipeline_mode<synchronous>, transform_indices = @transform_5, window_bounds = array<i64: 1, 32>}, {pipeline_mode = #tpu.pipeline_mode<synchronous>, transform_indices = @transform_6, window_bounds = array<i64: 32, 128>}, {pipeline_mode = #tpu.pipeline_mode<synchronous>, transform_indices = @transform_7, window_bounds = array<i64: 1, 128>}, {pipeline_mode = #tpu.pipeline_mode<synchronous>, transform_indices = @transform_8, window_bounds = array<i64: 16, 32>}, {pipeline_mode = #tpu.pipeline_mode<synchronous>, transform_indices = @transform_9, window_bounds = array<i64: 1, 32>}, {pipeline_mode = #tpu.pipeline_mode<synchronous>, transform_indices = @transform_10, window_bounds = array<i64: 32, 64>}, {pipeline_mode = #tpu.pipeline_mode<synchronous>, transform_indices = @transform_11, window_bounds = array<i64: 1, 64>}, {pipeline_mode = #tpu.pipeline_mode<synchronous>, transform_indices = @transform_12, window_bounds = array<i64: 64, 784>}, {pipeline_mode = #tpu.pipeline_mode<synchronous>, transform_indices = @transform_13, window_bounds = array<i64: 1, 784>}, {transform_indices = @transform_14, window_bounds = array<i64: 8, 784>}, {transform_indices = @transform_15, window_bounds = array<i64: 8, 128>}]} {
    %c0 = arith.constant 0 : index
    %c0_0 = arith.constant 0 : index
    %0 = vector.load %arg1[%c0, %c0_0] : memref<8x784xbf16, #tpu.memory_space<vmem>>, vector<8x784xbf16>
    %c0_1 = arith.constant 0 : index
    %c0_2 = arith.constant 0 : index
    %1 = vector.load %arg3[%c0_1, %c0_2] : memref<784x64xbf16, #tpu.memory_space<vmem>>, vector<784x64xbf16>
    %cst = arith.constant dense<0.000000e+00> : vector<8x64xf32>
    %2 = tpu.matmul %0, %1, %cst {dimension_numbers = #tpu.dot_dimension_numbers<[1], [0], [0], [1], [0, 0, 1, 1], [], []>} : vector<8x784xbf16>, vector<784x64xbf16>, vector<8x64xf32> -> vector<8x64xf32>
    %c0_3 = arith.constant 0 : index
    %c0_4 = arith.constant 0 : index
    %3 = vector.load %arg4[%c0_3, %c0_4] : memref<1x64xf32, #tpu.memory_space<vmem>>, vector<1x64xf32>
    %4 = vector.broadcast %3 : vector<1x64xf32> to vector<8x64xf32>
    %5 = arith.addf %2, %4 : vector<8x64xf32>
    %cst_5 = arith.constant 0.000000e+00 : f32
    %6 = vector.broadcast %cst_5 : f32 to vector<8x64xf32>
    %7 = arith.maximumf %5, %6 : vector<8x64xf32>
    %8 = arith.truncf %7 : vector<8x64xf32> to vector<8x64xbf16>
    %c0_6 = arith.constant 0 : index
    %c0_7 = arith.constant 0 : index
    %9 = vector.load %arg5[%c0_6, %c0_7] : memref<64x32xbf16, #tpu.memory_space<vmem>>, vector<64x32xbf16>
    %cst_8 = arith.constant dense<0.000000e+00> : vector<8x32xf32>
    %10 = tpu.matmul %8, %9, %cst_8 {dimension_numbers = #tpu.dot_dimension_numbers<[1], [0], [0], [1], [0, 0, 1, 1], [], []>} : vector<8x64xbf16>, vector<64x32xbf16>, vector<8x32xf32> -> vector<8x32xf32>
    %c0_9 = arith.constant 0 : index
    %c0_10 = arith.constant 0 : index
    %11 = vector.load %arg6[%c0_9, %c0_10] : memref<1x32xf32, #tpu.memory_space<vmem>>, vector<1x32xf32>
    %12 = vector.broadcast %11 : vector<1x32xf32> to vector<8x32xf32>
    %13 = arith.addf %10, %12 : vector<8x32xf32>
    %cst_11 = arith.constant 0.000000e+00 : f32
    %14 = vector.broadcast %cst_11 : f32 to vector<8x32xf32>
    %15 = arith.maximumf %13, %14 : vector<8x32xf32>
    %16 = arith.truncf %15 : vector<8x32xf32> to vector<8x32xbf16>
    %c0_12 = arith.constant 0 : index
    %c0_13 = arith.constant 0 : index
    %17 = vector.load %arg7[%c0_12, %c0_13] : memref<32x128xbf16, #tpu.memory_space<vmem>>, vector<32x128xbf16>
    %cst_14 = arith.constant dense<0.000000e+00> : vector<8x128xf32>
    %18 = tpu.matmul %16, %17, %cst_14 {dimension_numbers = #tpu.dot_dimension_numbers<[1], [0], [0], [1], [0, 0, 1, 1], [], []>} : vector<8x32xbf16>, vector<32x128xbf16>, vector<8x128xf32> -> vector<8x128xf32>
    %c0_15 = arith.constant 0 : index
    %c0_16 = arith.constant 0 : index
    %19 = vector.load %arg8[%c0_15, %c0_16] : memref<1x128xf32, #tpu.memory_space<vmem>>, vector<1x128xf32>
    %20 = vector.broadcast %19 : vector<1x128xf32> to vector<8x128xf32>
    %21 = arith.addf %18, %20 : vector<8x128xf32>
    %c0_17 = arith.constant 0 : index
    %c0_18 = arith.constant 0 : index
    %22 = vector.load %arg16[%c0_17, %c0_18] : memref<8x128xf32, #tpu.memory_space<vmem>>, vector<8x128xf32>
    tpu.vector_store %arg16[%c0_17, %c0_18], %21 {strides = array<i32>} : memref<8x128xf32, #tpu.memory_space<vmem>>, vector<8x128xf32>,
    %23 = vector.extract_strided_slice %21 {offsets = [0, 0], sizes = [8, 16], strides = [1, 1]} : vector<8x128xf32> to vector<8x16xf32>
    %24 = vector.extract_strided_slice %21 {offsets = [0, 16], sizes = [8, 16], strides = [1, 1]} : vector<8x128xf32> to vector<8x16xf32>
    %cst_19 = arith.constant 5.000000e-01 : f32
    %25 = vector.broadcast %cst_19 : f32 to vector<8x16xf32>
    %26 = arith.mulf %25, %24 : vector<8x16xf32>
    %27 = math.exp %26 : vector<8x16xf32>
    %c0_20 = arith.constant 0 : index
    %c0_21 = arith.constant 0 : index
    %28 = vector.load %arg2[%c0_20, %c0_21] : memref<8x16xf32, #tpu.memory_space<vmem>>, vector<8x16xf32>
    %29 = arith.mulf %27, %28 : vector<8x16xf32>
    %30 = arith.addf %29, %23 : vector<8x16xf32>
    %31 = arith.truncf %30 : vector<8x16xf32> to vector<8x16xbf16>
    %c0_22 = arith.constant 0 : index
    %c0_23 = arith.constant 0 : index
    %32 = vector.load %arg9[%c0_22, %c0_23] : memref<16x32xbf16, #tpu.memory_space<vmem>>, vector<16x32xbf16>
    %cst_24 = arith.constant dense<0.000000e+00> : vector<8x32xf32>
    %33 = tpu.matmul %31, %32, %cst_24 {dimension_numbers = #tpu.dot_dimension_numbers<[1], [0], [0], [1], [0, 0, 1, 1], [], []>} : vector<8x16xbf16>, vector<16x32xbf16>, vector<8x32xf32> -> vector<8x32xf32>
    %c0_25 = arith.constant 0 : index
    %c0_26 = arith.constant 0 : index
    %34 = vector.load %arg10[%c0_25, %c0_26] : memref<1x32xf32, #tpu.memory_space<vmem>>, vector<1x32xf32>
    %35 = vector.broadcast %34 : vector<1x32xf32> to vector<8x32xf32>
    %36 = arith.addf %33, %35 : vector<8x32xf32>
    %cst_27 = arith.constant 0.000000e+00 : f32
    %37 = vector.broadcast %cst_27 : f32 to vector<8x32xf32>
    %38 = arith.maximumf %36, %37 : vector<8x32xf32>
    %39 = arith.truncf %38 : vector<8x32xf32> to vector<8x32xbf16>
    %c0_28 = arith.constant 0 : index
    %c0_29 = arith.constant 0 : index
    %40 = vector.load %arg11[%c0_28, %c0_29] : memref<32x64xbf16, #tpu.memory_space<vmem>>, vector<32x64xbf16>
    %cst_30 = arith.constant dense<0.000000e+00> : vector<8x64xf32>
    %41 = tpu.matmul %39, %40, %cst_30 {dimension_numbers = #tpu.dot_dimension_numbers<[1], [0], [0], [1], [0, 0, 1, 1], [], []>} : vector<8x32xbf16>, vector<32x64xbf16>, vector<8x64xf32> -> vector<8x64xf32>
    %c0_31 = arith.constant 0 : index
    %c0_32 = arith.constant 0 : index
    %42 = vector.load %arg12[%c0_31, %c0_32] : memref<1x64xf32, #tpu.memory_space<vmem>>, vector<1x64xf32>
    %43 = vector.broadcast %42 : vector<1x64xf32> to vector<8x64xf32>
    %44 = arith.addf %41, %43 : vector<8x64xf32>
    %cst_33 = arith.constant 0.000000e+00 : f32
    %45 = vector.broadcast %cst_33 : f32 to vector<8x64xf32>
    %46 = arith.maximumf %44, %45 : vector<8x64xf32>
    %47 = arith.truncf %46 : vector<8x64xf32> to vector<8x64xbf16>
    %c0_34 = arith.constant 0 : index
    %c0_35 = arith.constant 0 : index
    %48 = vector.load %arg13[%c0_34, %c0_35] : memref<64x784xbf16, #tpu.memory_space<vmem>>, vector<64x784xbf16>
    %cst_36 = arith.constant dense<0.000000e+00> : vector<8x784xf32>
    %49 = tpu.matmul %47, %48, %cst_36 {dimension_numbers = #tpu.dot_dimension_numbers<[1], [0], [0], [1], [0, 0, 1, 1], [], []>} : vector<8x64xbf16>, vector<64x784xbf16>, vector<8x784xf32> -> vector<8x784xf32>
    %c0_37 = arith.constant 0 : index
    %c0_38 = arith.constant 0 : index
    %50 = vector.load %arg14[%c0_37, %c0_38] : memref<1x784xf32, #tpu.memory_space<vmem>>, vector<1x784xf32>
    %51 = vector.broadcast %50 : vector<1x784xf32> to vector<8x784xf32>
    %52 = arith.addf %49, %51 : vector<8x784xf32>
    %cst_39 = arith.constant 0.000000e+00 : f32
    %53 = vector.broadcast %cst_39 : f32 to vector<8x784xf32>
    %54 = arith.subf %53, %52 : vector<8x784xf32>
    %55 = math.exp %54 : vector<8x784xf32>
    %cst_40 = arith.constant 1.000000e+00 : f32
    %56 = vector.broadcast %cst_40 : f32 to vector<8x784xf32>
    %57 = arith.addf %56, %55 : vector<8x784xf32>
    %cst_41 = arith.constant 1.000000e+00 : f32
    %58 = vector.broadcast %cst_41 : f32 to vector<8x784xf32>
    %59 = arith.divf %58, %57 : vector<8x784xf32>
    %c0_42 = arith.constant 0 : index
    %c0_43 = arith.constant 0 : index
    %60 = vector.load %arg15[%c0_42, %c0_43] : memref<8x784xf32, #tpu.memory_space<vmem>>, vector<8x784xf32>
    tpu.vector_store %arg15[%c0_42, %c0_43], %59 {strides = array<i32>} : memref<8x784xf32, #tpu.memory_space<vmem>>, vector<8x784xf32>,
    return
  }
  func.func @transform_0(%arg0: i32) -> (i32, i32) {
    %c0_i32 = arith.constant 0 : i32
    %c0_i32_0 = arith.constant 0 : i32
    return %arg0, %c0_i32 : i32, i32
  }
  func.func @transform_1(%arg0: i32) -> (i32, i32) {
    %c0_i32 = arith.constant 0 : i32
    %c0_i32_0 = arith.constant 0 : i32
    return %arg0, %c0_i32 : i32, i32
  }
  func.func @transform_2(%arg0: i32) -> (i32, i32) {
    %c0_i32 = arith.constant 0 : i32
    %c0_i32_0 = arith.constant 0 : i32
    %c0_i32_1 = arith.constant 0 : i32
    return %c0_i32, %c0_i32_0 : i32, i32
  }
  func.func @transform_3(%arg0: i32) -> (i32, i32) {
    %c0_i32 = arith.constant 0 : i32
    %c0_i32_0 = arith.constant 0 : i32
    %c0_i32_1 = arith.constant 0 : i32
    return %c0_i32, %c0_i32_0 : i32, i32
  }
  func.func @transform_4(%arg0: i32) -> (i32, i32) {
    %c0_i32 = arith.constant 0 : i32
    %c0_i32_0 = arith.constant 0 : i32
    %c0_i32_1 = arith.constant 0 : i32
    return %c0_i32, %c0_i32_0 : i32, i32
  }
  func.func @transform_5(%arg0: i32) -> (i32, i32) {
    %c0_i32 = arith.constant 0 : i32
    %c0_i32_0 = arith.constant 0 : i32
    %c0_i32_1 = arith.constant 0 : i32
    return %c0_i32, %c0_i32_0 : i32, i32
  }
  func.func @transform_6(%arg0: i32) -> (i32, i32) {
    %c0_i32 = arith.constant 0 : i32
    %c0_i32_0 = arith.constant 0 : i32
    %c0_i32_1 = arith.constant 0 : i32
    return %c0_i32, %c0_i32_0 : i32, i32
  }
  func.func @transform_7(%arg0: i32) -> (i32, i32) {
    %c0_i32 = arith.constant 0 : i32
    %c0_i32_0 = arith.constant 0 : i32
    %c0_i32_1 = arith.constant 0 : i32
    return %c0_i32, %c0_i32_0 : i32, i32
  }
  func.func @transform_8(%arg0: i32) -> (i32, i32) {
    %c0_i32 = arith.constant 0 : i32
    %c0_i32_0 = arith.constant 0 : i32
    %c0_i32_1 = arith.constant 0 : i32
    return %c0_i32, %c0_i32_0 : i32, i32
  }
  func.func @transform_9(%arg0: i32) -> (i32, i32) {
    %c0_i32 = arith.constant 0 : i32
    %c0_i32_0 = arith.constant 0 : i32
    %c0_i32_1 = arith.constant 0 : i32
    return %c0_i32, %c0_i32_0 : i32, i32
  }
  func.func @transform_10(%arg0: i32) -> (i32, i32) {
    %c0_i32 = arith.constant 0 : i32
    %c0_i32_0 = arith.constant 0 : i32
    %c0_i32_1 = arith.constant 0 : i32
    return %c0_i32, %c0_i32_0 : i32, i32
  }
  func.func @transform_11(%arg0: i32) -> (i32, i32) {
    %c0_i32 = arith.constant 0 : i32
    %c0_i32_0 = arith.constant 0 : i32
    %c0_i32_1 = arith.constant 0 : i32
    return %c0_i32, %c0_i32_0 : i32, i32
  }
  func.func @transform_12(%arg0: i32) -> (i32, i32) {
    %c0_i32 = arith.constant 0 : i32
    %c0_i32_0 = arith.constant 0 : i32
    %c0_i32_1 = arith.constant 0 : i32
    return %c0_i32, %c0_i32_0 : i32, i32
  }
  func.func @transform_13(%arg0: i32) -> (i32, i32) {
    %c0_i32 = arith.constant 0 : i32
    %c0_i32_0 = arith.constant 0 : i32
    %c0_i32_1 = arith.constant 0 : i32
    return %c0_i32, %c0_i32_0 : i32, i32
  }
  func.func @transform_14(%arg0: i32) -> (i32, i32) {
    %c0_i32 = arith.constant 0 : i32
    %c0_i32_0 = arith.constant 0 : i32
    return %arg0, %c0_i32 : i32, i32
  }
  func.func @transform_15(%arg0: i32) -> (i32, i32) {
    %c0_i32 = arith.constant 0 : i32
    %c0_i32_0 = arith.constant 0 : i32
    return %arg0, %c0_i32 : i32, i32
  }
}

</mosaic_0001>

<bundles_post_ra>
// kernel: tpu_custom_call.1
= control target key start
LH: loop header
LB: loop body
LE: loop exit
PB: predicated region body
PF: predicated region fallthrough
CT: control target
= control target key end

     0   :  { %21 = vsyncpa [#allocation3], 0  ;;  %v1831_v43 = vmov 0.0   ;;  %vm1832_vm0 = vmmov 0   ;;  %vm479_vm1 = vcmask 130048   ;;  %s2251_s0 = inlined_call_operand.vmem [shape: bf16[8,784], index: 0, kind: input, shape index: {}]   ;;  %s2252_s1 = inlined_call_operand.vmem [shape: f32[8,16], index: 1, kind: input, shape index: {}]   ;;  %s2253_s2 = inlined_call_operand.vmem [shape: bf16[784,64], index: 2, kind: input, shape index: {}]   ;;  %s2254_s3 = inlined_call_operand.vmem [shape: f32[1,64], index: 3, kind: input, shape index: {}]   ;;  %s2255_s4 = inlined_call_operand.vmem [shape: bf16[64,32], index: 4, kind: input, shape index: {}]   ;;  %s2256_s5 = inlined_call_operand.vmem [shape: f32[1,32], index: 5, kind: input, shape index: {}]   ;;  %s2257_s6 = inlined_call_operand.vmem [shape: bf16[32,128], index: 6, kind: input, shape index: {}]   ;;  %s2258_s7 = inlined_call_operand.vmem [shape: f32[1,128], index: 7, kind: input, shape index: {}]   ;;  %s2259_s8 = inlined_call_operand.vmem [shape: bf16[16,32], index: 8, kind: input, shape index: {}]   ;;  %s2260_s9 = inlined_call_operand.vmem [shape: f32[1,32], index: 9, kind: input, shape index: {}]   ;;  %s2261_s10 = inlined_call_operand.vmem [shape: bf16[32,64], index: 10, kind: input, shape index: {}]   ;;  %s2262_s11 = inlined_call_operand.vmem [shape: f32[1,64], index: 11, kind: input, shape index: {}]   ;;  %s2263_s12 = inlined_call_operand.vmem [shape: bf16[64,784], index: 12, kind: input, shape index: {}]   ;;  %s2264_s13 = inlined_call_operand.vmem [shape: f32[1,784], index: 13, kind: input, shape index: {}]   ;;  %s2265_s14 = inlined_call_operand.hbm [shape: f32[8,784], index: 14, kind: output, shape index: {0}]   ;;  %s2266_s15 = inlined_call_operand.hbm [shape: f32[8,128], index: 15, kind: output, shape index: {1}]  }
   0x1   :  { %v1652_v0 = vld [vmem:[%s2253_s2 + $0x78] sm:$0xff]   ;;  %v1656_v4 = vld [vmem:[%s2253_s2 + $0x70] sm:$0xff]   ;;  %v1660_v8 = vld [vmem:[%s2253_s2 + $0x68] sm:$0xff]  }
   0x2   :  { %v1653_v1 = vld [vmem:[%s2253_s2 + $0x38] sm:$0xff]   ;;  %1507 = vmatprep.subr.bf16.mxu0 %v1652_v0  ;;  %v1657_v5 = vld [vmem:[%s2253_s2 + $0x30] sm:$0xff]   ;;  %v1661_v9 = vld [vmem:[%s2253_s2 + $0x28] sm:$0xff]  }
   0x3   :  { %v1654_v2 = vld [vmem:[%s2253_s2 + $0xf8] sm:$0xff]   ;;  %1508 = vmatpush3.bf16.msra.mxu0 %v1653_v1  ;;  %v1658_v6 = vld [vmem:[%s2253_s2 + $0xf0] sm:$0xff]   ;;  %v1662_v10 = vld [vmem:[%s2253_s2 + $0xe8] sm:$0xff]  }
   0x4   :  { %v1655_v3 = vld [vmem:[%s2253_s2 + $0xb8] sm:$0xff]   ;;  %1529 = vmatprep.subr.bf16.mxu1 %v1654_v2  ;;  %1509 = vmatprep.subr.bf16.mxu0 %v1656_v4  ;;  %v1659_v7 = vld [vmem:[%s2253_s2 + $0xb0] sm:$0xff]   ;;  %v1663_v11 = vld [vmem:[%s2253_s2 + $0xa8] sm:$0xff]  }
   0x5   :  { %1530 = vmatpush3.bf16.msra.mxu1 %v1655_v3  ;;  %v1664_v12 = vld [vmem:[%s2253_s2 + $0x60] sm:$0xff]   ;;  %v1668_v16 = vld [vmem:[%s2253_s2 + $0x58] sm:$0xff]   ;;  %v1672_v20 = vld [vmem:[%s2253_s2 + $0x50] sm:$0xff]  }
   0x6   :  { %1531 = vmatprep.subr.bf16.mxu1 %v1658_v6  ;;  %v1665_v13 = vld [vmem:[%s2253_s2 + $0x20] sm:$0xff]   ;;  %v1669_v17 = vld [vmem:[%s2253_s2 + $0x18] sm:$0xff]   ;;  %v1673_v21 = vld [vmem:[%s2253_s2 + $0x10] sm:$0xff]  }
   0x7   :  { %1510 = vmatpush3.bf16.msra.mxu0 %v1657_v5  ;;  %v1666_v14 = vld [vmem:[%s2253_s2 + $0xe0] sm:$0xff]   ;;  %v1670_v18 = vld [vmem:[%s2253_s2 + $0xd8] sm:$0xff]   ;;  %v1674_v22 = vld [vmem:[%s2253_s2 + $0xd0] sm:$0xff]  }
   0x8   :  { %1511 = vmatprep.subr.bf16.mxu0 %v1660_v8  ;;  %v1667_v15 = vld [vmem:[%s2253_s2 + $0xa0] sm:$0xff]   ;;  %v1671_v19 = vld [vmem:[%s2253_s2 + $0x98] sm:$0xff]   ;;  %v1675_v23 = vld [vmem:[%s2253_s2 + $0x90] sm:$0xff]  }
   0x9   :  { %1532 = vmatpush3.bf16.msra.mxu1 %v1659_v7  ;;  %v1676_v24 = vld [vmem:[%s2253_s2 + $0x48] sm:$0xff]   ;;  %v1680_v28 = vld [vmem:[%s2253_s2 + $0x40] sm:$0xff]   ;;  %v1686_v35 = vld [vmem:[%s2253_s2 + $0x178] sm:$0xff]  }
   0xa   :  { %1533 = vmatprep.subr.bf16.mxu1 %v1662_v10  ;;  %v1677_v25 = vld [vmem:[%s2253_s2 + $0x8] sm:$0xff]   ;;  %v1681_v29 = vld [vmem:[%s2253_s2] sm:$0xff]   ;;  %v1689_v39 = vld [vmem:[%s2253_s2 + $0x138] sm:$0xff]  }
   0xb   :  { %1512 = vmatpush3.bf16.msra.mxu0 %v1661_v9  ;;  %v1678_v26 = vld [vmem:[%s2253_s2 + $0xc8] sm:$0xff]   ;;  %v1682_v30 = vld [vmem:[%s2253_s2 + $0xc0] sm:$0xff]   ;;  %v1690_v40 = vld [vmem:[%s2253_s2 + $0x170] sm:$0xff]  }
   0xc   :  { %1513 = vmatprep.subr.bf16.mxu0 %v1664_v12  ;;  %v1679_v27 = vld [vmem:[%s2253_s2 + $0x88] sm:$0xff]   ;;  %v52_v31 = vld [vmem:[%s2251_s0] sm:$0xff]  ;;  %v1691_v41 = vld [vmem:[%s2253_s2 + $0x130] sm:$0xff]  }
   0xd   :  { %1534 = vmatpush3.bf16.msra.mxu1 %v1663_v11  ;;  %v1401_v32 = vcombine.low %v52_v31, %v52_v31  ;;  %v1402_v33 = vcombine.high %v52_v31, %v52_v31  ;;  %v1685_v34 = vld [vmem:[%s2253_s2 + $0x80] sm:$0xff]   ;;  %v53_v36 = vld [vmem:[%s2251_s0 + $0x8] sm:$0xff]  ;;  %v1696_v47 = vld [vmem:[%s2253_s2 + $0x158] sm:$0xff]  }
   0xe   :  { %1535 = vmatprep.subr.bf16.mxu1 %v1666_v14  ;;  %v1403_v37 = vcombine.low %v53_v36, %v53_v36  ;;  %v1404_v38 = vcombine.high %v53_v36, %v53_v36  ;;  %v1692_v42 = vld [vmem:[%s2253_s2 + $0x168] sm:$0xff]   ;;  %v1694_v45 = vld [vmem:[%s2253_s2 + $0x160] sm:$0xff]   ;;  %v1697_v48 = vld [vmem:[%s2253_s2 + $0x118] sm:$0xff]  }
   0xf   :  { %1514 = vmatpush3.bf16.msra.mxu0 %v1665_v13  ;;  %515 = vmatprep.mubr.bf16.mxu0 %v1402_v33  ;;  %v1693_v44 = vld [vmem:[%s2253_s2 + $0x128] sm:$0xff]   ;;  %v1695_v46 = vld [vmem:[%s2253_s2 + $0x120] sm:$0xff]   ;;  %v1698_v49 = vld [vmem:[%s2253_s2 + $0x150] sm:$0xff]  }
  0x10   :  { %1515 = vmatprep.subr.bf16.mxu0 %v1668_v16  ;;  %555 = vmatprep.mubr.bf16.mxu1 %v1404_v38  ;;  %v1704_v50 = vld [vmem:[%s2253_s2 + $0x180] sm:$0xff]   ;;  %v54_v51 = vld [vmem:[%s2251_s0 + $0x10] sm:$0xff]  ;;  %v1707_v54 = vld [vmem:[%s2251_s0 + $0x18] ss:$0 sps:$4 sm:$0xff]  }
  0x11   :  { %1536 = vmatpush3.bf16.msra.mxu1 %v1667_v15  ;;  %v1699_v52 = vld [vmem:[%s2253_s2 + $0x110] sm:$0xff]   ;;  %v1406_v53 = vcombine.high %v54_v51, %v54_v51  ;;  %v1700_v55 = vld [vmem:[%s2253_s2 + $0x148] sm:$0xff]   ;;  %v1702_v57 = vld [vmem:[%s2253_s2 + $0x140] sm:$0xff]   ;;  %v1405_v59 = vcombine.low %v54_v51, %v54_v51 }
  0x12   :  { %1537 = vmatprep.subr.bf16.mxu1 %v1670_v18  ;;  %v1701_v56 = vld [vmem:[%s2253_s2 + $0x108] sm:$0xff]   ;;  %v1703_v58 = vld [vmem:[%s2253_s2 + $0x100] sm:$0xff]  }
  0x13   :  { %1516 = vmatpush3.bf16.msra.mxu0 %v1669_v17 }
  0x14   :  { %1517 = vmatprep.subr.bf16.mxu0 %v1672_v20 }
  0x15   :  { %1538 = vmatpush3.bf16.msra.mxu1 %v1671_v19 }
  0x16   :  { %1539 = vmatprep.subr.bf16.mxu1 %v1674_v22 }
  0x17   :  { %1518 = vmatpush3.bf16.msra.mxu0 %v1673_v21 }
  0x18   :  { %1519 = vmatprep.subr.bf16.mxu0 %v1676_v24 }
  0x19   :  { %1540 = vmatpush3.bf16.msra.mxu1 %v1675_v23 }
  0x1a   :  { %1541 = vmatprep.subr.bf16.mxu1 %v1678_v26 }
  0x1b   :  { %1520 = vmatpush3.bf16.msra.mxu0 %v1677_v25 }
  0x1c   :  { %1521 = vmatprep.subr.bf16.mxu0 %v1680_v28 }
  0x1d   :  { %1542 = vmatpush3.bf16.msra.mxu1 %v1679_v27 }
  0x1e   :  { %1543 = vmatprep.subr.bf16.mxu1 %v1682_v30 }
  0x1f   :  { %1522 = vmatpush3.bf16.msra.mxu0 %v1681_v29 }
  0x20   :  { %1551 = vmatprep.subr.bf16.mxu0 %v1686_v35 }
  0x21   :  { %1544 = vmatpush3.bf16.msra.mxu1 %v1685_v34 }
  0x22   :  { %516 = vmatmul.mubr.bf16.vlgmr.msra.gmra.mxu0 %v1401_v32  ;;  %1593 = vmatprep.subr.bf16.mxu1 %v1831_v43 }
  0x23   :  { %1552 = vmatpush3.bf16.msra.mxu0 %v1689_v39  ;;  %595 = vmatprep.mubr.bf16.mxu0 %v1406_v53 }
  0x24   :  { %556 = vmatmul.mubr.bf16.vlgmr.msra.gmra.mxu1 %v1403_v37  ;;  %1553 = vmatprep.subr.bf16.mxu0 %v1690_v40 }
  0x25   :  { %1595 = vmatprep.mubr.msk.bf16.mxu1 %vm1832_vm0, %v1831_v43  ;;  %1594 = vmatpush3.bf16.msra.mxu1 %v1704_v50 }
  0x26   :  { %1599 = vmatprep.subr.bf16.mxu1 %v1831_v43 }
  0x27   :  { %1554 = vmatpush3.bf16.msra.mxu0 %v1691_v41 }
  0x28   :  { %1555 = vmatprep.subr.bf16.mxu0 %v1692_v42 }
  0x2b   :  { %1556 = vmatpush3.bf16.msra.mxu0 %v1693_v44 }
  0x2c   :  { %1557 = vmatprep.subr.bf16.mxu0 %v1694_v45  ;;  %1596 = vmatmul.mubr.msk.bf16.vlgmr.msra.gmra.mxu1 %vm479_vm1, %v1707_v54 }
  0x2d   :  { %1607 = vmatprep.mubr.msk.bf16.mxu1 %vm1832_vm0, %v1831_v43 }
  0x2f   :  { %1558 = vmatpush3.bf16.msra.mxu0 %v1695_v46 }
  0x30   :  { %1559 = vmatprep.subr.bf16.mxu0 %v1696_v47 }
  0x33   :  { %1560 = vmatpush3.bf16.msra.mxu0 %v1697_v48 }
  0x34   :  { %1561 = vmatprep.subr.bf16.mxu0 %v1698_v49 }
  0x37   :  { %1562 = vmatpush3.bf16.msra.mxu0 %v1699_v52 }
  0x38   :  { %1563 = vmatprep.subr.bf16.mxu0 %v1700_v55 }
  0x3b   :  { %1564 = vmatpush3.bf16.msra.mxu0 %v1701_v56 }
  0x3c   :  { %1565 = vmatprep.subr.bf16.mxu0 %v1702_v57 }
  0x3f   :  { %1566 = vmatpush3.bf16.msra.mxu0 %v1703_v58 }
  0x40   :  { %1619 = vmatprep.subr.bf16.mxu0 %v1831_v43 }
  0x42   :  { %596 = vmatmul.mubr.bf16.vlgmr.msra.gmra.mxu0 %v1405_v59 }
  0x43   :  { %22 = vsyncpa [#allocation5], 0  ;;  %1621 = vmatprep.mubr.msk.bf16.mxu0 %vm1832_vm0, %v1831_v43  ;;  %v1708_v60 = vld [vmem:[%s2255_s4 + $0x18] sm:$0xff]   ;;  %v1709_v61 = vld [vmem:[%s2255_s4 + $0x10] sm:$0xff]   ;;  %vm684_vm2 = vcmask 523264   ;;  %s1833_s16 = smov 16  }
  0x44   :  { %1600 = vmatpush3.bf16.msra.mxu1 %v1708_v60  ;;  %v1710_v62 = vld [vmem:[%s2255_s4 + $0x8] sm:$0xff]   ;;  %v1711_v63 = vld [vmem:[%s2255_s4] sm:$0xff]   ;;  %vm753_vm3 = vcmask 261120   ;;  %v1722_v58 = vld [vmem:[%s2263_s12 + $0xb4] ss:$28 sps:$4 sm:$0xff]   ;;  %s1836_s27 = smov [#allocation4]  }
  0x45   :  { %1601 = vmatprep.subr.bf16.mxu1 %v1831_v43  ;;  %v1400_v13 = vld [vmem:[%s2254_s3] ss:$0 sm:$0xff]  ;;  %v1712_v25 = vld [vmem:[%s2257_s6 + $0x8] sm:$0xff]   ;;  %v1725_v59 = vld [vmem:[%s2263_s12 + $0x74] ss:$28 sps:$4 sm:$0xff]  }
  0x46   :  { %v1713_v27 = vld [vmem:[%s2257_s6] sm:$0xff]   ;;  %v1715_v47 = vld [vmem:[%s2261_s10 + $0x8] sm:$0xff]  }
  0x47   :  { %v801_v28 = vld [vmem:[%s2252_s1] sm:$0xff]  ;;  %v1719_v57 = vld [vmem:[%s2263_s12 + $0xac] ss:$28 sps:$4 sm:$0xff]  }
  0x48   :  { %1602 = vmatpush3.bf16.msra.mxu1 %v1709_v61  ;;  %803 = vrot.lane.b32.xlu0 %v801_v28, %s1833_s16  ;;  %v1458_v29 = vld [vmem:[%s2256_s5] ss:$0 sm:$0xff]  ;;  %v1717_v56 = vld [vmem:[%s2263_s12 + $0xa8] ss:$28 sps:$4 sm:$0xff]   ;;  %v1723_v60 = vld [vmem:[%s2263_s12 + $0x70] ss:$28 sps:$4 sm:$0xff]  }
  0x49   :  { %1603 = vmatprep.subr.bf16.mxu1 %v1831_v43  ;;  %v1714_v37 = vld [vmem:[%s2259_s8] sm:$0xff]   ;;  %v1731_v61 = vld [vmem:[%s2263_s12 + $0x3c] ss:$28 sps:$4 sm:$0xff]  }
  0x4a   :  { %1620 = vmatpush3.bf16.msra.mxu0 %v1714_v37  ;;  %v1464_v38 = vld [vmem:[%s2258_s7] ss:$0 sm:$0xff]  ;;  %s1834_s7 = smov 112  }
  0x4b   :  { %v1716_v55 = vld [vmem:[%s2261_s10] sm:$0xff]   ;;  %1168 = vmatprep.subr.bf16.mxu0 %v1719_v57  ;;  %s1388_s10 = sshll.u32 %s1836_s27, 4  ;;  %s1389_s10 = int_to_ptr.vmem [resolvable:$true] %s1388_s10 }
  0x4c   :  { %1604 = vmatpush3.bf16.msra.mxu1 %v1710_v62  ;;  %v1729_v62 = vld [vmem:[%s2263_s12 + $0x38] ss:$28 sps:$4 sm:$0xff]   ;;  %s1787_s3 = scalar_lea.vmem %s1389_s10, 128  ;;  %p1792_p1 = scmp.lt.s32.totalorder %s1389_s10, %s1389_s10 }
  0x4d   :  { %1605 = vmatprep.subr.bf16.mxu1 %v1831_v43  ;;  %p1788_p0 = scmp.ne.s32.totalorder %s1389_s10, %s1787_s3  ;;  %p1793_p2 = scmp.lt.s32.totalorder %s1787_s3, %s1787_s3 }
  0x4f   :  { %p1794_p3 = por %p1793_p2, %p1792_p1 }
  0x50   :  { %1606 = vmatpush3.bf16.msra.mxu1 %v1711_v63  ;;  %v1468_v63 = vld [vmem:[%s2260_s9] ss:$0 sm:$0xff] }
  0x51   :  { %1611 = vmatprep.subr.bf16.mxu1 %v1831_v43  ;;  %p1795_p4 = pnand %p1794_p3, %p1788_p0 }
  0xba   :  { %v804_v49 = vpop.permute.xlu0 %803 }
  0xe2   :  { %v1523_v0 = vpop.f32.mrf.mxu0 }
  0xe4   :  { %v1524_v1 = vpop.f32.mrf.mxu0  ;;  %v1545_v2 = vpop.f32.mrf.mxu1 }
  0xe5   :  { %v1525_v12 = vadd.f32 %v1524_v1, %v1523_v0 }
  0xe6   :  { %v1526_v3 = vpop.f32.mrf.mxu0  ;;  %v1546_v4 = vpop.f32.mrf.mxu1 }
  0xe7   :  { %v518_v14 = vadd.f32 %v1525_v12, %v1400_v13  ;;  %v1547_v15 = vadd.f32 %v1546_v4, %v1545_v2  ;;  %v1737_v12 = vld [vmem:[%s2263_s12 + $0x4] ss:$28 sps:$4 sm:$0xff]   ;;  %v1740_v13 = vld [vmem:[%s2263_s12 + $0xc] ss:$28 sps:$4 sm:$0xff]  }
  0xe8   :  { %v1527_v5 = vpop.f32.mrf.mxu0  ;;  %v1548_v6 = vpop.f32.mrf.mxu1 }
  0xe9   :  { %v558_v18 = vadd.f32 %v1547_v15, %v518_v14  ;;  %v1720_v5 = vld [vmem:[%s2263_s12 + $0xb0] ss:$28 sps:$4 sm:$0xff]   ;;  %v1735_v14 = vld [vmem:[%s2263_s12] ss:$28 sps:$4 sm:$0xff]   ;;  %v1738_v15 = vld [vmem:[%s2263_s12 + $0x8] ss:$28 sps:$4 sm:$0xff]  }
  0xea   :  { %v1549_v7 = vpop.f32.mrf.mxu1 }
  0xeb   :  { %v1728_v7 = vld [vmem:[%s2263_s12 + $0x7c] ss:$28 sps:$4 sm:$0xff]  }
  0xec   :  { %v637_v8 = vpop.f32.mrf.mxu1 }
  0xee   :  { %v1597_v9 = vpop.f32.mrf.mxu1 }
  0xef   :  { %v1726_v9 = vld [vmem:[%s2263_s12 + $0x78] ss:$28 sps:$4 sm:$0xff]  }
  0xf0   :  { %v640_v10 = vpop.f32.mrf.mxu1 }
  0xf1   :  { %v1734_v10 = vld [vmem:[%s2263_s12 + $0x44] ss:$28 sps:$4 sm:$0xff]  }
  0xf2   :  { %v1598_v11 = vpop.f32.mrf.mxu1 }
  0xf3   :  { %v1732_v11 = vld [vmem:[%s2263_s12 + $0x40] ss:$28 sps:$4 sm:$0xff]  }
 0x102   :  { %v1567_v16 = vpop.f32.mrf.mxu0 }
 0x104   :  { %v1568_v17 = vpop.f32.mrf.mxu0 }
 0x105   :  { %v1569_v19 = vadd.f32 %v1568_v17, %v1567_v16  ;;  %v1743_v16 = vld [vmem:[%s2263_s12 + $0xbc] ss:$28 sps:$4 sm:$0xff]   ;;  %v1835_v17 = vmov 0  }
 0x106   :  { %v1570_v20 = vpop.f32.mrf.mxu0 }
 0x107   :  { %v598_v21 = vadd.f32 %v1569_v19, %v558_v18  ;;  %v1471_v18 = vld [vmem:[%s2262_s11] ss:$0 sm:$0xff] }
 0x108   :  { %v1571_v22 = vpop.f32.mrf.mxu0 }
 0x109   :  { %v638_v23 = vadd.f32 %v637_v8, %v598_v21 }
 0x10b   :  { %v643_v24 = vmax.f32 %v638_v23, 0.0 }
 0x10d   :  { %v644_v26 = vpack.c.bf16 %v643_v24, %v643_v24  ;;  %v1741_v24 = vld [vmem:[%s2263_s12 + $0xb8] ss:$28 sps:$4 sm:$0xff]  }
 0x10f   :  { %1608 = vmatmul.mubr.msk.bf16.vlgmr.msra.gmra.mxu1 %vm684_vm2, %v644_v26 }
 0x110   :  { %1612 = vmatpush3.bf16.msra.mxu1 %v1712_v25  ;;  %1615 = vmatprep.mubr.msk.bf16.mxu1 %vm1832_vm0, %v1831_v43  ;;  %v1744_v25 = vld [vmem:[%s2263_s12 + $0xc0] ss:$28 sps:$4 sm:$0xff]  }
 0x111   :  { %1613 = vmatprep.subr.bf16.mxu1 %v1831_v43 }
 0x114   :  { %1614 = vmatpush3.bf16.msra.mxu1 %v1713_v27  ;;  %v1747_v27 = vld [vmem:[%s2263_s12 + $0x84] ss:$28 sps:$4 sm:$0xff]  }
 0x115   :  { %1625 = vmatprep.subr.bf16.mxu1 %v1831_v43 }
 0x1cf   :  { %v722_v30 = vpop.f32.mrf.mxu1 }
 0x1d0   :  { %v723_v31 = vadd.f32 %v1458_v29, %v722_v30  ;;  %v1745_v29 = vld [vmem:[%s2263_s12 + $0x80] ss:$28 sps:$4 sm:$0xff]   ;;  %v1748_v30 = vld [vmem:[%s2263_s12 + $0x88] ss:$28 sps:$4 sm:$0xff]  }
 0x1d1   :  { %v1609_v32 = vpop.f32.mrf.mxu1 }
 0x1d2   :  { %v728_v33 = vmax.f32 %v723_v31, 0.0  ;;  %v1751_v31 = vld [vmem:[%s2263_s12 + $0x4c] ss:$28 sps:$4 sm:$0xff]  }
 0x1d3   :  { %v725_v34 = vpop.f32.mrf.mxu1  ;;  %v1749_v32 = vld [vmem:[%s2263_s12 + $0x48] ss:$28 sps:$4 sm:$0xff]  }
 0x1d4   :  { %v729_v35 = vpack.c.bf16 %v728_v33, %v728_v33  ;;  %v1752_v33 = vld [vmem:[%s2263_s12 + $0x50] ss:$28 sps:$4 sm:$0xff]  }
 0x1d5   :  { %v1610_v36 = vpop.f32.mrf.mxu1  ;;  %v1755_v34 = vld [vmem:[%s2263_s12 + $0x14] ss:$28 sps:$4 sm:$0xff]  }
 0x1d6   :  { %1616 = vmatmul.mubr.msk.bf16.vlgmr.msra.gmra.mxu1 %vm753_vm3, %v729_v35  ;;  %v1753_v35 = vld [vmem:[%s2263_s12 + $0x10] ss:$28 sps:$4 sm:$0xff]   ;;  %v1756_v36 = vld [vmem:[%s2263_s12 + $0x18] ss:$28 sps:$4 sm:$0xff]  }
 0x1d7   :  { %1629 = vmatprep.mubr.msk.bf16.mxu1 %vm1832_vm0, %v1831_v43  ;;  %1626 = vmatpush3.bf16.msra.mxu1 %v1715_v47 }
 0x1d8   :  { %1627 = vmatprep.subr.bf16.mxu1 %v1831_v43 }
 0x1db   :  { %1628 = vmatpush3.bf16.msra.mxu1 %v1716_v55 }
 0x1dc   :  { %1209 = vmatprep.subr.bf16.mxu1 %v1722_v58 }
 0x296   :  { %v791_v39 = vpop.f32.mrf.mxu1 }
 0x297   :  { %v792_v40 = vadd.f32 %v1464_v38, %v791_v39 }
 0x298   :  { %v1617_v41 = vpop.f32.mrf.mxu1 }
 0x299   :  { %797 = vst [vmem:[#allocation4] sm:$0xff] %v792_v40  ;;  %808 = vrot.lane.b32.xlu0 %v792_v40, %s1833_s16  ;;  %v798_v45 = vmul.f32 0.5, %v792_v40 }
 0x29a   :  { %v794_v42 = vpop.f32.mrf.mxu1 }
 0x29b   :  { %v799_v46 = vmul.f32 1.442695, %v798_v45 }
 0x29c   :  { %v1618_v44 = vpop.f32.mrf.mxu1 }
 0x29d   :  { %1757 = vpow2.f32 %v799_v46 }
 0x2aa   :  { %v1758_v48 = vpop.eup %1757 }
 0x2ab   :  { %v806_v50 = vmul.f32 %v1758_v48, %v804_v49 }
 0x30b   :  { %v809_v51 = vpop.permute.xlu0 %808 }
 0x30c   :  { %v811_v52 = vadd.f32 %v809_v51, %v806_v50 }
 0x30e   :  { %v812_v53 = vpack.c.bf16 %v811_v52, %v811_v52 }
 0x310   :  { %823 = vrot.lane.b32.xlu1 %v812_v53, %s1834_s7 }
 0x382   :  { %v824_v54 = vpop.permute.xlu1 %823 }
 0x383   :  { %1622 = vmatmul.mubr.msk.bf16.vlgmr.msra.gmra.mxu0 %vm479_vm1, %v824_v54 }
 0x384   :  { %1169 = vmatpush1.bf16.msra.mxu0 %v1717_v56  ;;  %1192 = vmatprep.mubr.bf16.mxu0 %v1835_v17 }
 0x385   :  { %1170 = vmatprep.subr.bf16.mxu0 %v1725_v59 }
 0x388   :  { %1171 = vmatpush1.bf16.msra.mxu0 %v1723_v60 }
 0x389   :  { %1172 = vmatprep.subr.bf16.mxu0 %v1731_v61 }
 0x38c   :  { %1173 = vmatpush1.bf16.msra.mxu0 %v1729_v62 }
 0x38d   :  { %1174 = vmatprep.subr.bf16.mxu0 %v1737_v12 }
 0x390   :  { %1175 = vmatpush1.bf16.msra.mxu0 %v1735_v14 }
 0x391   :  { %1250 = vmatprep.subr.bf16.mxu0 %v1743_v16 }
 0x443   :  { %v868_v0 = vpop.f32.mrf.mxu0 }
 0x444   :  { %v869_v1 = vadd.f32 %v1468_v63, %v868_v0 }
 0x445   :  { %v1623_v2 = vpop.f32.mrf.mxu0 }
 0x446   :  { %v874_v3 = vmax.f32 %v869_v1, 0.0 }
 0x447   :  { %v871_v4 = vpop.f32.mrf.mxu0 }
 0x448   :  { %v875_v6 = vpack.c.bf16 %v874_v3, %v874_v3 }
 0x449   :  { %v1624_v8 = vpop.f32.mrf.mxu0 }
 0x44a   :  { %1630 = vmatmul.mubr.msk.bf16.vlgmr.msra.gmra.mxu1 %vm753_vm3, %v875_v6 }
 0x44b   :  { %1210 = vmatpush1.bf16.msra.mxu1 %v1720_v5  ;;  %1233 = vmatprep.mubr.bf16.mxu1 %v1835_v17 }
 0x44c   :  { %1211 = vmatprep.subr.bf16.mxu1 %v1728_v7 }
 0x44f   :  { %1212 = vmatpush1.bf16.msra.mxu1 %v1726_v9 }
 0x450   :  { %1213 = vmatprep.subr.bf16.mxu1 %v1734_v10 }
 0x453   :  { %1214 = vmatpush1.bf16.msra.mxu1 %v1732_v11 }
 0x454   :  { %1215 = vmatprep.subr.bf16.mxu1 %v1740_v13 }
 0x457   :  { %1216 = vmatpush1.bf16.msra.mxu1 %v1738_v15 }
 0x458   :  { %1633 = vmatprep.subr.bf16.mxu1 %v1831_v43 }
 0x50a   :  { %v936_v19 = vpop.f32.mrf.mxu1 }
 0x50b   :  { %v937_v20 = vadd.f32 %v1471_v18, %v936_v19 }
 0x50c   :  { %v1631_v21 = vpop.f32.mrf.mxu1 }
 0x50d   :  { %v942_v22 = vmax.f32 %v937_v20, 0.0 }
 0x50e   :  { %v939_v23 = vpop.f32.mrf.mxu1 }
 0x50f   :  { %v943_v26 = vpack.c.bf16 %v942_v22, %v942_v22 }
 0x510   :  { %v1632_v28 = vpop.f32.mrf.mxu1 }
 0x511   :  { %1503 = vmatmul.mubr.msk.bf16.vlgmr.msra.gmra.mxu0 %vm684_vm2, %v943_v26  ;;  %1504 = vmatmul.mubr.msk.bf16.vlgmr.msra.gmra.mxu1 %vm684_vm2, %v943_v26 }
 0x512   :  { %1251 = vmatpush1.bf16.msra.mxu0 %v1741_v24  ;;  %1634 = vmatpush3.bf16.msra.mxu1 %v1744_v25 }
 0x513   :  { %1252 = vmatprep.subr.bf16.mxu0 %v1747_v27  ;;  %1635 = vmatprep.subr.bf16.mxu1 %v1831_v43 }
 0x514   :  { %1274 = vmatprep.mubr.bf16.mxu0 %v1835_v17  ;;  %1641 = vmatprep.mubr.msk.bf16.mxu1 %vm1832_vm0, %v1831_v43 }
 0x516   :  { %1253 = vmatpush1.bf16.msra.mxu0 %v1745_v29  ;;  %1636 = vmatpush3.bf16.msra.mxu1 %v1748_v30 }
 0x517   :  { %1254 = vmatprep.subr.bf16.mxu0 %v1751_v31  ;;  %1637 = vmatprep.subr.bf16.mxu1 %v1831_v43 }
 0x51a   :  { %1255 = vmatpush1.bf16.msra.mxu0 %v1749_v32  ;;  %1638 = vmatpush3.bf16.msra.mxu1 %v1752_v33 }
 0x51b   :  { %1256 = vmatprep.subr.bf16.mxu0 %v1755_v34  ;;  %1639 = vmatprep.subr.bf16.mxu1 %v1831_v43 }
 0x51e   :  { %1257 = vmatpush1.bf16.msra.mxu0 %v1753_v35  ;;  %1640 = vmatpush3.bf16.msra.mxu1 %v1756_v36 }
 0x521   :  { %1505 = vmatmul.mubr.msk.bf16.vlgmr.msra.gmra.mxu0 %vm684_vm2, %v943_v26  ;;  %1642 = vmatmul.mubr.msk.bf16.vlgmr.msra.gmra.mxu1 %vm684_vm2, %v943_v26 }
 0x522   :  { %1798 = shalt.err (!%p1795_p4)
}
 0x523   :  { %1391 = dma.vmem_to_hbm [thread:$0]  %s1389_s10, 128, %s2266_s15, [#allocation5]   ;;  %v978_v43 = vlaneseq  ;;  %v976_v40 = vld [vmem:[%s2264_s13] sm:$0x7f] }
 0x524   :  { %s1837_s13 = smov [#allocation2]  }
 0x525   :  { %v979_v37 = vshrl.u32 %v978_v43, 7  ;;  %s1378_s15 = sshll.u32 %s1837_s13, 4  ;;  %s1379_s15 = int_to_ptr.vmem [resolvable:$true] %s1378_s15 }
 0x526   :  { %s1807_s16 = scalar_lea.vmem %s1379_s15, 896  ;;  %p1812_p6 = scmp.lt.s32.totalorder %s1379_s15, %s1379_s15 }
 0x527   :  { %v980_v38 = vsub.s32 0, %v979_v37  ;;  %v988_v39 = vsub.s32 2, %v979_v37  ;;  %v984_v41 = vsub.s32 1, %v979_v37  ;;  %v992_v42 = vsub.s32 3, %v979_v37  ;;  %p1808_p5 = scmp.ne.s32.totalorder %s1379_s15, %s1807_s16  ;;  %p1813_p7 = scmp.lt.s32.totalorder %s1807_s16, %s1807_s16 }
 0x528   :  { %v996_v4 = vsub.s32 4, %v979_v37  ;;  %v1004_v5 = vsub.s32 6, %v979_v37  ;;  %v1000_v6 = vsub.s32 5, %v979_v37 }
 0x529   :  { %v981_v44 = vrot.slane %v976_v40, %v980_v38  ;;  %v989_v45 = vrot.slane %v976_v40, %v988_v39  ;;  %v985_v46 = vrot.slane %v976_v40, %v984_v41  ;;  %v993_v47 = vrot.slane %v976_v40, %v992_v42  ;;  %p1814_p8 = por %p1813_p7, %p1812_p6 }
 0x52a   :  { %v997_v7 = vrot.slane %v976_v40, %v996_v4  ;;  %v1005_v8 = vrot.slane %v976_v40, %v1004_v5  ;;  %v1001_v9 = vrot.slane %v976_v40, %v1000_v6 }
 0x52b   :  { %p1815_p9 = pnand %p1814_p8, %p1808_p5 }
 0x5d1   :  { %v1194_v48 = vpop.f32.mrf.mxu0  ;;  %v1235_v49 = vpop.f32.mrf.mxu1 }
 0x5d2   :  { %v1195_v50 = vadd.f32 %v1194_v48, %v981_v44  ;;  %v1236_v51 = vadd.f32 %v1235_v49, %v989_v45 }
 0x5d3   :  { %v1196_v52 = vpop.f32.mrf.mxu0  ;;  %v1237_v53 = vpop.f32.mrf.mxu1 }
 0x5d4   :  { %v1323_v54 = vsub.f32 0.0, %v1195_v50  ;;  %v1325_v55 = vsub.f32 0.0, %v1236_v51  ;;  %v1197_v56 = vadd.f32 %v1196_v52, %v985_v46  ;;  %v1238_v57 = vadd.f32 %v1237_v53, %v993_v47 }
 0x5d5   :  { %v1198_v58 = vpop.f32.mrf.mxu0  ;;  %v1239_v59 = vpop.f32.mrf.mxu1 }
 0x5d6   :  { %v1330_v60 = vmul.f32 1.442695, %v1323_v54  ;;  %v1334_v61 = vmul.f32 1.442695, %v1325_v55  ;;  %v1324_v62 = vsub.f32 0.0, %v1197_v56  ;;  %v1326_v63 = vsub.f32 0.0, %v1238_v57 }
 0x5d7   :  { %v1199_v0 = vpop.f32.mrf.mxu0  ;;  %v1240_v1 = vpop.f32.mrf.mxu1 }
 0x5d8   :  { %1759 = vpow2.f32 %v1330_v60  ;;  %v1332_v2 = vmul.f32 1.442695, %v1324_v62  ;;  %v1336_v3 = vmul.f32 1.442695, %v1326_v63 }
 0x5d9   :  { %1761 = vpow2.f32 %v1334_v61 }
 0x5da   :  { %1763 = vpow2.f32 %v1332_v2 }
 0x5db   :  { %1765 = vpow2.f32 %v1336_v3 }
 0x5e1   :  { %v1276_v10 = vpop.f32.mrf.mxu0  ;;  %v1317_v11 = vpop.f32.mrf.mxu1 }
 0x5e2   :  { %v1277_v12 = vadd.f32 %v1276_v10, %v997_v7  ;;  %v1318_v13 = vadd.f32 %v1317_v11, %v1005_v8 }
 0x5e3   :  { %v1278_v14 = vpop.f32.mrf.mxu0  ;;  %v1643_v15 = vpop.f32.mrf.mxu1 }
 0x5e4   :  { %v1327_v16 = vsub.f32 0.0, %v1277_v12  ;;  %v1279_v17 = vadd.f32 %v1278_v14, %v1001_v9  ;;  %v1329_v19 = vsub.f32 0.0, %v1318_v13 }
 0x5e5   :  { %v1760_v18 = vpop.eup %1759  ;;  %v1280_v20 = vpop.f32.mrf.mxu0 }
 0x5e6   :  { %v1320_v21 = vpop.f32.mrf.mxu1  ;;  %v1762_v22 = vpop.eup %1761  ;;  %v1344_v23 = vadd.f32 1.0, %v1760_v18  ;;  %v1328_v24 = vsub.f32 0.0, %v1279_v17  ;;  %v1338_v31 = vmul.f32 1.442695, %v1327_v16  ;;  %v1342_v33 = vmul.f32 1.442695, %v1329_v19 }
 0x5e7   :  { %v1764_v25 = vpop.eup %1763  ;;  %v1346_v26 = vadd.f32 1.0, %v1762_v22  ;;  %v1281_v27 = vpop.f32.mrf.mxu0 }
 0x5e8   :  { %v1644_v28 = vpop.f32.mrf.mxu1  ;;  %v1766_v29 = vpop.eup %1765  ;;  %1767 = vrcp.f32 %v1344_v23  ;;  %v1345_v30 = vadd.f32 1.0, %v1764_v25  ;;  %v1340_v34 = vmul.f32 1.442695, %v1328_v24 }
 0x5e9   :  { %1769 = vrcp.f32 %v1346_v26  ;;  %v1347_v32 = vadd.f32 1.0, %v1766_v29 }
 0x5ea   :  { %1771 = vrcp.f32 %v1345_v30 }
 0x5eb   :  { %1773 = vrcp.f32 %v1347_v32 }
 0x5ec   :  { %1775 = vpow2.f32 %v1338_v31 }
 0x5ed   :  { %1777 = vpow2.f32 %v1342_v33 }
 0x5ee   :  { %1779 = vpow2.f32 %v1340_v34 }
 0x5f5   :  { %v1768_v35 = vpop.eup %1767 }
 0x5f6   :  { %v1770_v36 = vpop.eup %1769  ;;  %1365 = vst [vmem:[#allocation2] sm:$0xff] %v1768_v35 }
 0x5f7   :  { %v1772_v43 = vpop.eup %1771  ;;  %1367 = vst [vmem:[#allocation2 + $0x10] sm:$0xff] %v1770_v36 }
 0x5f8   :  { %v1774_v37 = vpop.eup %1773  ;;  %1366 = vst [vmem:[#allocation2 + $0x8] sm:$0xff] %v1772_v43 }
 0x5f9   :  { %v1776_v38 = vpop.eup %1775  ;;  %1368 = vst [vmem:[#allocation2 + $0x18] sm:$0xff] %v1774_v37 }
 0x5fa   :  { %v1778_v39 = vpop.eup %1777  ;;  %v1348_v40 = vadd.f32 1.0, %v1776_v38 }
 0x5fb   :  { %v1780_v41 = vpop.eup %1779  ;;  %v1350_v42 = vadd.f32 1.0, %v1778_v39 }
 0x5fc   :  { %1781 = vrcp.f32 %v1348_v40  ;;  %v1349_v44 = vadd.f32 1.0, %v1780_v41 }
 0x5fd   :  { %1783 = vrcp.f32 %v1350_v42 }
 0x5fe   :  { %1785 = vrcp.f32 %v1349_v44 }
 0x609   :  { %v1782_v45 = vpop.eup %1781 }
 0x60a   :  { %v1784_v46 = vpop.eup %1783  ;;  %1369 = vst [vmem:[#allocation2 + $0x20] sm:$0xff] %v1782_v45 }
 0x60b   :  { %v1786_v47 = vpop.eup %1785  ;;  %1371 = vst.msk [vmem:[#allocation2 + $0x30] sm:$0xff] %vm479_vm1, %v1784_v46 }
 0x60c   :  { %1370 = vst [vmem:[#allocation2 + $0x28] sm:$0xff] %v1786_v47 }
 0x60d   :  { %1818 = shalt.err (!%p1815_p9)
}
 0x60e   :  { %1381 = dma.vmem_to_hbm [thread:$0]  %s1379_s15, 896, %s2265_s14, [#allocation3]  }
 0x60f   :  { %1827 = dma.done.wait [#allocation3], 896  }
 0x610   :  { %1828 = vsyncadd [#allocation3], 4294966400 }
 0x611   :  { %1829 = dma.done.wait [#allocation5], 128  }
 0x612   :  { %1830 = vsyncadd [#allocation5], 4294967168 }
 0x613   :  { %1398 = vsyncpa [#allocation3], 1 }
 0x614   :  { %1399 = vsyncpa [#allocation5], 1 }

</bundles_post_ra>
